<compile_context>
chip_gen: v5e
topology: v5e:2x2
jax: 0.10.0
libtpu: 0.0.40
codegen_flags: <defaults>
</compile_context>

<pallas_src>
import jax
import jax.numpy as jnp
from jax import lax
from jax.experimental import pallas as pl
from jax.experimental.pallas import tpu as pltpu


def qnet_kernel(x_ref, w0t_ref, w1t_ref, w2_ref, b01_ref, b2_ref, o_ref):
    H = w0t_ref.shape[0]
    wdt = w0t_ref.dtype  # f32 or bf16; accumulation is always f32

    # Layer 0: contract obs on the LAST axis of both operands -> [H, tb]
    # (x stays [tb, obs]; no host-side transpose needed).
    h = lax.dot_general(
        w0t_ref[...], x_ref[...].astype(wdt),
        dimension_numbers=(((1,), (1,)), ((), ())),
        preferred_element_type=jnp.float32)
    h = jnp.maximum(h + b01_ref[0:H, :], 0.0)          # bias broadcast along lanes

    # Hidden layer: [H, H] @ [H, tb] -> [H, tb]
    h = jnp.dot(w1t_ref[...], h.astype(wdt), preferred_element_type=jnp.float32)
    h = jnp.maximum(h + b01_ref[H:, :], 0.0)

    # Output head: contract H on dim 0 of both operands -> [tb, A], i.e. the
    # kernel emits the result directly in [batch, actions] layout.
    q = lax.dot_general(
        h.astype(wdt), w2_ref[...],
        dimension_numbers=(((0,), (0,)), ((), ())),
        preferred_element_type=jnp.float32)
    o_ref[...] = (q + b2_ref[...]).astype(o_ref.dtype)


_TB_CAP = 8192  # VMEM cost is ~ (obs+H+A)*4 B per batch column; a few MB at most.


def _pick_tb(B):
    """Largest batch tile: a single grid step whenever possible (per-step
    overhead dominates at this size); for huge B prefer multiples of 256 so
    the MXU N dimension is filled on v6e/v7x (128 already fills v5e)."""
    if B <= _TB_CAP:
        return B
    for t in range(_TB_CAP, 255, -256):      # multiples of 256
        if B % t == 0:
            return t
    for t in range(_TB_CAP, 127, -128):      # multiples of 128
        if B % t == 0:
            return t
    return B  # ragged huge batch: one block covering everything (still only a few MB)


def prepare_params(params, *, weight_dtype=None):
    """One-time host-side layout prep (call ONCE, outside the hot path):
    transpose the first two weight matrices to [out, in], keep the head weight
    as [H, A], pack the two hidden biases into a single [2H, 1] ref and the
    head bias into [1, A].  Optionally cast weights to bf16 (native MXU dtype);
    biases stay f32 (bias add / ReLU run in f32)."""
    (w0, b0), (w1, b1), (w2, b2) = params
    H = w0.shape[1]
    A = w2.shape[1]
    w0t, w1t = w0.T, w1.T
    if weight_dtype is not None:
        w0t, w1t, w2 = (w0t.astype(weight_dtype), w1t.astype(weight_dtype),
                        w2.astype(weight_dtype))
    b01 = jnp.concatenate([b0, b1]).reshape(2 * H, 1).astype(jnp.float32)
    b2r = b2.reshape(1, A).astype(jnp.float32)
    return w0t, w1t, w2, b01, b2r


def qnetwork_forward(x, prepared, *, tb=None):
    """Fused MLP forward.  x: [B, obs] float32 -> q: [B, n_actions] float32.
    `prepared` comes from prepare_params()."""
    B, obs = x.shape
    w0t, w1t, w2, b01, b2 = prepared
    H = w0t.shape[0]
    A = w2.shape[1]

    if tb is None:
        tb = _pick_tb(B)
    assert B % tb == 0, f"batch {B} must be divisible by tile {tb}"

    def resident(shape):
        # Full-array block, same index every grid step -> stays in VMEM, no re-DMA.
        return pl.BlockSpec(shape, lambda i: (0, 0))

    flops = 2 * B * (obs * H + H * H + H * A)
    bytes_accessed = 4 * (B * obs + B * A) + 4 * (obs * H + H * H + H * A + 2 * H + A)

    # NOTE: for huge batches on v7x one could use pltpu.CORE_PARALLEL on the
    # batch axis to split across both TensorCores; at classic-control sizes a
    # single step on a single core is faster, so plain "parallel" is kept.
    return pl.pallas_call(
        qnet_kernel,
        out_shape=jax.ShapeDtypeStruct((B, A), jnp.float32),
        grid_spec=pltpu.PrefetchScalarGridSpec(
            num_scalar_prefetch=0,
            grid=(B // tb,),
            in_specs=[
                pl.BlockSpec((tb, obs), lambda i: (i, 0)),  # x tile, no transpose
                resident((H, obs)),                          # w0^T
                resident((H, H)),                            # w1^T
                resident((H, A)),                            # w2 (untransposed)
                resident((2 * H, 1)),                        # [b0; b1]
                resident((1, A)),                            # b2
            ],
            out_specs=pl.BlockSpec((tb, A), lambda i: (i, 0)),
        ),
        compiler_params=pltpu.CompilerParams(
            dimension_semantics=("parallel",),
        ),
        cost_estimate=pl.CostEstimate(
            flops=flops, transcendentals=0, bytes_accessed=bytes_accessed),
    )(x, w0t, w1t, w2, b01, b2)


def init_params(key, obs_dim, hidden, n_actions, last_layer_std=1.0):
    """Deterministic init mimicking layer_init('orthogonal_gain'): orthogonal
    weights (gain sqrt(2) for hidden layers, q_last_layer_std for the head),
    zero biases.  Weights stored as [in, out]."""
    k0, k1, k2 = jax.random.split(key, 3)
    orth = jax.nn.initializers.orthogonal
    w0 = orth(scale=jnp.sqrt(2.0))(k0, (obs_dim, hidden), jnp.float32)
    w1 = orth(scale=jnp.sqrt(2.0))(k1, (hidden, hidden), jnp.float32)
    w2 = orth(scale=last_layer_std)(k2, (hidden, n_actions), jnp.float32)
    b0 = jnp.zeros((hidden,), jnp.float32)
    b1 = jnp.zeros((hidden,), jnp.float32)
    b2 = jnp.zeros((n_actions,), jnp.float32)
    return (w0, b0), (w1, b1), (w2, b2)


def reference_forward(x, params):
    (w0, b0), (w1, b1), (w2, b2) = params
    h = jnp.maximum(x @ w0 + b0, 0.0)
    h = jnp.maximum(h @ w1 + b1, 0.0)
    return h @ w2 + b2


if __name__ == "__main__":
    # Classic-control-like shapes (e.g. CartPole): obs_dim=4, n_actions=2,
    # q_hidden_size=32, q_num_hidden_layers=1, batch=256.
    B, OBS, H, A = 256, 4, 32, 2

    key = jax.random.PRNGKey(0)
    kx, kp = jax.random.split(key)
    x = jax.random.normal(kx, (B, OBS), jnp.float32)
    params = init_params(kp, OBS, H, A, last_layer_std=1.0)
    prepared = prepare_params(params)            # one-time layout prep

    q_ref = reference_forward(x, params)

    # Main path: tb = B -> grid=(1,), single invocation, no wrapper copies.
    q = jax.block_until_ready(qnetwork_forward(x, prepared))
    assert q.shape == (B, A)
    assert jnp.allclose(q, q_ref, atol=1e-5, rtol=1e-5), "mismatch vs reference"

    # Multi-step grid path (forced tile) still correct.
    q2 = jax.block_until_ready(qnetwork_forward(x, prepared, tb=128))
    assert jnp.allclose(q2, q_ref, atol=1e-5, rtol=1e-5), "tiled-path mismatch"

    # Small / ragged batch: single block == full batch (masked but correct).
    q_small = jax.block_until_ready(qnetwork_forward(x[:16], prepared))
    assert jnp.allclose(q_small, q_ref[:16], atol=1e-5, rtol=1e-5), "small-batch mismatch"

    # bf16-weight path: native MXU dtype, f32 accumulation (loose tolerance).
    prepared_bf16 = prepare_params(params, weight_dtype=jnp.bfloat16)
    q_bf16 = jax.block_until_ready(qnetwork_forward(x, prepared_bf16))
    assert jnp.allclose(q_bf16, q_ref, atol=1e-1, rtol=1e-1), "bf16-path mismatch"

    print("KERNEL_OK")
</pallas_src>

<mosaic_0001>
module attributes {stable_mosaic.version = 11 : i64} {
  func.func @qnet_kernel(%arg0: i32, %arg1: memref<256x4xf32, #tpu.memory_space<vmem>>, %arg2: memref<32x4xf32, #tpu.memory_space<vmem>>, %arg3: memref<32x32xf32, #tpu.memory_space<vmem>>, %arg4: memref<32x2xf32, #tpu.memory_space<vmem>>, %arg5: memref<64x1xf32, #tpu.memory_space<vmem>>, %arg6: memref<1x2xf32, #tpu.memory_space<vmem>>, %arg7: memref<256x2xf32, #tpu.memory_space<vmem>>) attributes {dimension_semantics = [#tpu.dimension_semantics<parallel>], iteration_bounds = array<i64: 1>, scalar_prefetch = 0 : i64, scratch_operands = 0 : i64, tpu.core_type = #tpu.core_type<tc>, window_params = [{transform_indices = @transform_0, window_bounds = array<i64: 256, 4>}, {pipeline_mode = #tpu.pipeline_mode<synchronous>, transform_indices = @transform_1, window_bounds = array<i64: 32, 4>}, {pipeline_mode = #tpu.pipeline_mode<synchronous>, transform_indices = @transform_2, window_bounds = array<i64: 32, 32>}, {pipeline_mode = #tpu.pipeline_mode<synchronous>, transform_indices = @transform_3, window_bounds = array<i64: 32, 2>}, {pipeline_mode = #tpu.pipeline_mode<synchronous>, transform_indices = @transform_4, window_bounds = array<i64: 64, 1>}, {pipeline_mode = #tpu.pipeline_mode<synchronous>, transform_indices = @transform_5, window_bounds = array<i64: 1, 2>}, {transform_indices = @transform_6, window_bounds = array<i64: 256, 2>}]} {
    %c0 = arith.constant 0 : index
    %c0_0 = arith.constant 0 : index
    %0 = vector.load %arg2[%c0, %c0_0] : memref<32x4xf32, #tpu.memory_space<vmem>>, vector<32x4xf32>
    %c0_1 = arith.constant 0 : index
    %c0_2 = arith.constant 0 : index
    %1 = vector.load %arg1[%c0_1, %c0_2] : memref<256x4xf32, #tpu.memory_space<vmem>>, vector<256x4xf32>
    %cst = arith.constant dense<0.000000e+00> : vector<32x256xf32>
    %2 = tpu.matmul %0, %1, %cst {dimension_numbers = #tpu.dot_dimension_numbers<[1], [1], [0], [0], [0, 0, 1, 0], [], []>} : vector<32x4xf32>, vector<256x4xf32>, vector<32x256xf32> -> vector<32x256xf32>
    %c0_3 = arith.constant 0 : index
    %c0_4 = arith.constant 0 : index
    %3 = vector.load %arg5[%c0_3, %c0_4] : memref<64x1xf32, #tpu.memory_space<vmem>>, vector<32x1xf32>
    %4 = vector.broadcast %3 : vector<32x1xf32> to vector<32x256xf32>
    %5 = arith.addf %2, %4 : vector<32x256xf32>
    %cst_5 = arith.constant 0.000000e+00 : f32
    %6 = vector.broadcast %cst_5 : f32 to vector<32x256xf32>
    %7 = arith.maximumf %5, %6 : vector<32x256xf32>
    %c0_6 = arith.constant 0 : index
    %c0_7 = arith.constant 0 : index
    %8 = vector.load %arg3[%c0_6, %c0_7] : memref<32x32xf32, #tpu.memory_space<vmem>>, vector<32x32xf32>
    %cst_8 = arith.constant dense<0.000000e+00> : vector<32x256xf32>
    %9 = tpu.matmul %8, %7, %cst_8 {dimension_numbers = #tpu.dot_dimension_numbers<[1], [0], [0], [1], [0, 0, 1, 1], [], []>} : vector<32x32xf32>, vector<32x256xf32>, vector<32x256xf32> -> vector<32x256xf32>
    %c32 = arith.constant 32 : index
    %c0_9 = arith.constant 0 : index
    %10 = vector.load %arg5[%c32, %c0_9] : memref<64x1xf32, #tpu.memory_space<vmem>>, vector<32x1xf32>
    %11 = vector.broadcast %10 : vector<32x1xf32> to vector<32x256xf32>
    %12 = arith.addf %9, %11 : vector<32x256xf32>
    %cst_10 = arith.constant 0.000000e+00 : f32
    %13 = vector.broadcast %cst_10 : f32 to vector<32x256xf32>
    %14 = arith.maximumf %12, %13 : vector<32x256xf32>
    %c0_11 = arith.constant 0 : index
    %c0_12 = arith.constant 0 : index
    %15 = vector.load %arg4[%c0_11, %c0_12] : memref<32x2xf32, #tpu.memory_space<vmem>>, vector<32x2xf32>
    %cst_13 = arith.constant dense<0.000000e+00> : vector<256x2xf32>
    %16 = tpu.matmul %14, %15, %cst_13 {dimension_numbers = #tpu.dot_dimension_numbers<[0], [0], [1], [1], [0, 1, 1, 1], [], []>} : vector<32x256xf32>, vector<32x2xf32>, vector<256x2xf32> -> vector<256x2xf32>
    %c0_14 = arith.constant 0 : index
    %c0_15 = arith.constant 0 : index
    %17 = vector.load %arg6[%c0_14, %c0_15] : memref<1x2xf32, #tpu.memory_space<vmem>>, vector<1x2xf32>
    %18 = vector.broadcast %17 : vector<1x2xf32> to vector<256x2xf32>
    %19 = arith.addf %16, %18 : vector<256x2xf32>
    %c0_16 = arith.constant 0 : index
    %c0_17 = arith.constant 0 : index
    %20 = vector.load %arg7[%c0_16, %c0_17] : memref<256x2xf32, #tpu.memory_space<vmem>>, vector<256x2xf32>
    tpu.vector_store %arg7[%c0_16, %c0_17], %19 {strides = array<i32>} : memref<256x2xf32, #tpu.memory_space<vmem>>, vector<256x2xf32>,
    return
  }
  func.func @transform_0(%arg0: i32) -> (i32, i32) {
    %c0_i32 = arith.constant 0 : i32
    %c0_i32_0 = arith.constant 0 : i32
    return %arg0, %c0_i32 : i32, i32
  }
  func.func @transform_1(%arg0: i32) -> (i32, i32) {
    %c0_i32 = arith.constant 0 : i32
    %c0_i32_0 = arith.constant 0 : i32
    %c0_i32_1 = arith.constant 0 : i32
    return %c0_i32, %c0_i32_0 : i32, i32
  }
  func.func @transform_2(%arg0: i32) -> (i32, i32) {
    %c0_i32 = arith.constant 0 : i32
    %c0_i32_0 = arith.constant 0 : i32
    %c0_i32_1 = arith.constant 0 : i32
    return %c0_i32, %c0_i32_0 : i32, i32
  }
  func.func @transform_3(%arg0: i32) -> (i32, i32) {
    %c0_i32 = arith.constant 0 : i32
    %c0_i32_0 = arith.constant 0 : i32
    %c0_i32_1 = arith.constant 0 : i32
    return %c0_i32, %c0_i32_0 : i32, i32
  }
  func.func @transform_4(%arg0: i32) -> (i32, i32) {
    %c0_i32 = arith.constant 0 : i32
    %c0_i32_0 = arith.constant 0 : i32
    %c0_i32_1 = arith.constant 0 : i32
    return %c0_i32, %c0_i32_0 : i32, i32
  }
  func.func @transform_5(%arg0: i32) -> (i32, i32) {
    %c0_i32 = arith.constant 0 : i32
    %c0_i32_0 = arith.constant 0 : i32
    %c0_i32_1 = arith.constant 0 : i32
    return %c0_i32, %c0_i32_0 : i32, i32
  }
  func.func @transform_6(%arg0: i32) -> (i32, i32) {
    %c0_i32 = arith.constant 0 : i32
    %c0_i32_0 = arith.constant 0 : i32
    return %arg0, %c0_i32 : i32, i32
  }
}

</mosaic_0001>

<bundles_post_ra>
// kernel: tpu_custom_call.1
= control target key start
LH: loop header
LB: loop body
LE: loop exit
PB: predicated region body
PF: predicated region fallthrough
CT: control target
= control target key end

     0   :  { %vm83_vm0 = vcmask 31744   ;;  %v781_v21 = vmov 0   ;;  %vm286_vm1 = vcmask 261120   ;;  %vm646_vm2 = vcmask 15360   ;;  %s1227_s0 = inlined_call_operand.vmem [shape: f32[256,4], index: 0, kind: input, shape index: {}]   ;;  %s1228_s4 = inlined_call_operand.vmem [shape: f32[64,1], index: 4, kind: input, shape index: {}]   ;;  %s1229_s1 = inlined_call_operand.vmem [shape: f32[32,4], index: 1, kind: input, shape index: {}]   ;;  %s1230_s2 = inlined_call_operand.vmem [shape: f32[32,32], index: 2, kind: input, shape index: {}]   ;;  %s1231_s3 = inlined_call_operand.vmem [shape: f32[32,2], index: 3, kind: input, shape index: {}]   ;;  %s1232_s5 = inlined_call_operand.vmem [shape: f32[1,2], index: 5, kind: input, shape index: {}]   ;;  %s1233_s6 = inlined_call_operand.vmem [shape: f32[256,2], index: 6, kind: output, shape index: {}]  }
   0x1   :  { %v42_v0 = vld [vmem:[%s1227_s0 + $0x78] sm:$0xff]  ;;  %v41_v2 = vld [vmem:[%s1227_s0 + $0x70] sm:$0xff]  ;;  %v40_v4 = vld [vmem:[%s1227_s0 + $0x68] sm:$0xff]  ;;  %778 = vset.pattern.permute.xlu1 %v781_v21  ;;  %777 = vset.pattern.permute.xlu0 %v781_v21 }
   0x2   :  { %v58_v1 = vld [vmem:[%s1227_s0 + $0xf8] sm:$0xff]  ;;  %683 = vmatpush.xpose.msk.msra.mxu0 %vm83_vm0, %v42_v0  ;;  %v57_v3 = vld [vmem:[%s1227_s0 + $0xf0] sm:$0xff]  ;;  %v56_v5 = vld [vmem:[%s1227_s0 + $0xe8] sm:$0xff]  ;;  %779 = vset.pattern.permute.xlu2 %v781_v21 }
   0x3   :  { %703 = vmatpush.xpose.msk.msra.mxu1 %vm83_vm0, %v58_v1  ;;  %v39_v6 = vld [vmem:[%s1227_s0 + $0x60] sm:$0xff]  ;;  %v38_v8 = vld [vmem:[%s1227_s0 + $0x58] sm:$0xff]  ;;  %v37_v10 = vld [vmem:[%s1227_s0 + $0x50] sm:$0xff] }
   0x4   :  { %v55_v7 = vld [vmem:[%s1227_s0 + $0xe0] sm:$0xff]  ;;  %v54_v9 = vld [vmem:[%s1227_s0 + $0xd8] sm:$0xff]  ;;  %v53_v11 = vld [vmem:[%s1227_s0 + $0xd0] sm:$0xff] }
   0x5   :  { %v36_v12 = vld [vmem:[%s1227_s0 + $0x48] sm:$0xff]  ;;  %v35_v14 = vld [vmem:[%s1227_s0 + $0x40] sm:$0xff]  ;;  %v34_v16 = vld [vmem:[%s1227_s0 + $0x38] sm:$0xff] }
   0x6   :  { %684 = vmatpush.xpose.msk.msra.mxu0 %vm83_vm0, %v41_v2  ;;  %v52_v13 = vld [vmem:[%s1227_s0 + $0xc8] sm:$0xff]  ;;  %v51_v15 = vld [vmem:[%s1227_s0 + $0xc0] sm:$0xff]  ;;  %v50_v17 = vld [vmem:[%s1227_s0 + $0xb8] sm:$0xff] }
   0x7   :  { %704 = vmatpush.xpose.msk.msra.mxu1 %vm83_vm0, %v57_v3  ;;  %v60_v18 = vld [vmem:[%s1228_s4 + $0x8] sm:$0xff]  ;;  %v33_v19 = vld [vmem:[%s1227_s0 + $0x30] sm:$0xff]  ;;  %v59_v24 = vld [vmem:[%s1228_s4] sm:$0xff] }
   0x8   :  { %v49_v20 = vld [vmem:[%s1227_s0 + $0xb0] sm:$0xff]  ;;  %70 = vperm.xlu1 %778, %v60_v18   ;;  %v32_v22 = vld [vmem:[%s1227_s0 + $0x28] sm:$0xff]  ;;  %v62_v25 = vld [vmem:[%s1228_s4 + $0x18] sm:$0xff] }
   0x9   :  { %v48_v23 = vld [vmem:[%s1227_s0 + $0xa8] sm:$0xff]  ;;  %v31_v26 = vld [vmem:[%s1227_s0 + $0x20] sm:$0xff]  ;;  %80 = vperm.xlu0 %777, %v62_v25   ;;  %v30_v28 = vld [vmem:[%s1227_s0 + $0x18] sm:$0xff] }
   0xa   :  { %685 = vmatpush.xpose.msk.msra.mxu0 %vm83_vm0, %v40_v4  ;;  %v47_v27 = vld [vmem:[%s1227_s0 + $0xa0] sm:$0xff]  ;;  %v46_v29 = vld [vmem:[%s1227_s0 + $0x98] sm:$0xff]  ;;  %v61_v30 = vld [vmem:[%s1228_s4 + $0x10] sm:$0xff] }
   0xb   :  { %705 = vmatpush.xpose.msk.msra.mxu1 %vm83_vm0, %v56_v5  ;;  %v29_v31 = vld [vmem:[%s1227_s0 + $0x10] sm:$0xff]  ;;  %v28_v33 = vld [vmem:[%s1227_s0 + $0x8] sm:$0xff]  ;;  %v265_v36 = vld [vmem:[%s1228_s4 + $0x38] sm:$0xff] }
   0xc   :  { %v45_v32 = vld [vmem:[%s1227_s0 + $0x90] sm:$0xff]  ;;  %v44_v34 = vld [vmem:[%s1227_s0 + $0x88] sm:$0xff]  ;;  %v27_v37 = vld [vmem:[%s1227_s0] sm:$0xff] }
   0xd   :  { %v264_v35 = vld [vmem:[%s1228_s4 + $0x30] sm:$0xff]  ;;  %v43_v38 = vld [vmem:[%s1227_s0 + $0x80] sm:$0xff]  ;;  %v24_v40 = vld [vmem:[%s1229_s1 + $0x8] sm:$0xff] }
   0xe   :  { %686 = vmatpush.xpose.msk.msra.mxu0 %vm83_vm0, %v39_v6  ;;  %v23_v39 = vld [vmem:[%s1229_s1] sm:$0xff]  ;;  %v25_v41 = vld [vmem:[%s1229_s1 + $0x10] sm:$0xff]  ;;  %v26_v42 = vld [vmem:[%s1229_s1 + $0x18] sm:$0xff] }
   0xf   :  { %706 = vmatpush.xpose.msk.msra.mxu1 %vm83_vm0, %v55_v7  ;;  %v262_v63 = vld [vmem:[%s1228_s4 + $0x20] sm:$0xff] }
  0x10   :  { %65 = vperm.xlu1 %778, %v59_v24   ;;  %268 = vperm.xlu2 %779, %v262_v63   ;;  %v365_v21 = vld [vmem:[%s1231_s3] sm:$0xff] }
  0x11   :  { %75 = vperm.xlu0 %777, %v61_v30  }
  0x12   :  { %687 = vmatpush.xpose.msk.msra.mxu0 %vm83_vm0, %v38_v8  ;;  %v258_v8 = vld [vmem:[%s1230_s2] sm:$0xff] }
  0x13   :  { %707 = vmatpush.xpose.msk.msra.mxu1 %vm83_vm0, %v54_v9  ;;  %v263_v9 = vld [vmem:[%s1228_s4 + $0x28] sm:$0xff] }
  0x16   :  { %688 = vmatpush.xpose.msk.msra.mxu0 %vm83_vm0, %v37_v10  ;;  %v259_v10 = vld [vmem:[%s1230_s2 + $0x8] sm:$0xff] }
  0x17   :  { %708 = vmatpush.xpose.msk.msra.mxu1 %vm83_vm0, %v53_v11  ;;  %v260_v11 = vld [vmem:[%s1230_s2 + $0x10] sm:$0xff] }
  0x18   :  { %283 = vperm.xlu1 %778, %v265_v36   ;;  %273 = vperm.xlu2 %779, %v263_v9  }
  0x19   :  { %278 = vperm.xlu0 %777, %v264_v35  }
  0x1a   :  { %689 = vmatpush.xpose.msk.msra.mxu0 %vm83_vm0, %v36_v12  ;;  %v261_v12 = vld [vmem:[%s1230_s2 + $0x18] sm:$0xff] }
  0x1b   :  { %709 = vmatpush.xpose.msk.msra.mxu1 %vm83_vm0, %v52_v13 }
  0x1e   :  { %690 = vmatpush.xpose.msk.msra.mxu0 %vm83_vm0, %v35_v14  ;;  %v368_v14 = vld [vmem:[%s1231_s3 + $0x18] sm:$0xff] }
  0x1f   :  { %710 = vmatpush.xpose.msk.msra.mxu1 %vm83_vm0, %v51_v15  ;;  %v367_v15 = vld [vmem:[%s1231_s3 + $0x10] sm:$0xff] }
  0x22   :  { %691 = vmatpush.xpose.msk.msra.mxu0 %vm83_vm0, %v34_v16  ;;  %v366_v16 = vld [vmem:[%s1231_s3 + $0x8] sm:$0xff] }
  0x23   :  { %711 = vmatpush.xpose.msk.msra.mxu1 %vm83_vm0, %v50_v17 }
  0x26   :  { %692 = vmatpush.xpose.msk.msra.mxu0 %vm83_vm0, %v33_v19 }
  0x27   :  { %712 = vmatpush.xpose.msk.msra.mxu1 %vm83_vm0, %v49_v20 }
  0x2a   :  { %693 = vmatpush.xpose.msk.msra.mxu0 %vm83_vm0, %v32_v22 }
  0x2b   :  { %713 = vmatpush.xpose.msk.msra.mxu1 %vm83_vm0, %v48_v23 }
  0x2e   :  { %694 = vmatpush.xpose.msk.msra.mxu0 %vm83_vm0, %v31_v26 }
  0x2f   :  { %714 = vmatpush.xpose.msk.msra.mxu1 %vm83_vm0, %v47_v27 }
  0x32   :  { %695 = vmatpush.xpose.msk.msra.mxu0 %vm83_vm0, %v30_v28 }
  0x33   :  { %715 = vmatpush.xpose.msk.msra.mxu1 %vm83_vm0, %v46_v29 }
  0x36   :  { %696 = vmatpush.xpose.msk.msra.mxu0 %vm83_vm0, %v29_v31 }
  0x37   :  { %716 = vmatpush.xpose.msk.msra.mxu1 %vm83_vm0, %v45_v32 }
  0x3a   :  { %697 = vmatpush.xpose.msk.msra.mxu0 %vm83_vm0, %v28_v33 }
  0x3b   :  { %717 = vmatpush.xpose.msk.msra.mxu1 %vm83_vm0, %v44_v34 }
  0x3e   :  { %698 = vmatpush.xpose.msk.msra.mxu0 %vm83_vm0, %v27_v37 }
  0x3f   :  { %718 = vmatpush.xpose.msk.msra.mxu1 %vm83_vm0, %v43_v38 }
  0x41   :  { %699 = vmatmul.msk.f32.vlgmr.msra.gmra.mxu0 %vm83_vm0, %v23_v39 }
  0x42   :  { %719 = vmatmul.msk.f32.vlgmr.msra.gmra.mxu1 %vm83_vm0, %v23_v39  ;;  %545 = vmatpush.msrb.mxu0 %v368_v14 }
  0x43   :  { %763 = vmatpush.msrb.mxu1 %v368_v14 }
  0x44   :  { %546 = vmatpush.msrb.mxu0 %v367_v15 }
  0x45   :  { %766 = vmatpush.msrb.mxu1 %v367_v15 }
  0x46   :  { %547 = vmatpush.msrb.mxu0 %v366_v16 }
  0x47   :  { %769 = vmatpush.msrb.mxu1 %v366_v16 }
  0x48   :  { %548 = vmatpush.msrb.mxu0 %v365_v21 }
  0x49   :  { %700 = vmatmul.msk.f32.gmra.mxu0 %vm83_vm0, %v24_v40  ;;  %772 = vmatpush.msrb.mxu1 %v365_v21 }
  0x4a   :  { %720 = vmatmul.msk.f32.gmra.mxu1 %vm83_vm0, %v24_v40 }
  0x51   :  { %701 = vmatmul.msk.f32.gmra.mxu0 %vm83_vm0, %v25_v41 }
  0x52   :  { %721 = vmatmul.msk.f32.gmra.mxu1 %vm83_vm0, %v25_v41 }
  0x59   :  { %702 = vmatmul.msk.f32.gmra.mxu0 %vm83_vm0, %v26_v42 }
  0x5a   :  { %722 = vmatmul.msk.f32.gmra.mxu1 %vm83_vm0, %v26_v42 }
  0x6a   :  { %v269_v13 = vpop.permute.xlu2 %268 }
  0x72   :  { %v274_v24 = vpop.permute.xlu2 %273 }
  0x7a   :  { %v71_v48 = vpop.permute.xlu1 %70 }
  0x7b   :  { %v81_v47 = vpop.permute.xlu0 %80 }
  0x82   :  { %v66_v58 = vpop.permute.xlu1 %65 }
  0x83   :  { %v76_v51 = vpop.permute.xlu0 %75 }
  0x8a   :  { %v284_v38 = vpop.permute.xlu1 %283 }
  0x8b   :  { %v279_v31 = vpop.permute.xlu0 %278 }
  0xbe   :  { %v209_v43 = vpop.f32.mrf.mxu0 }
  0xbf   :  { %v238_v44 = vpop.f32.mrf.mxu1  ;;  %v210_v0 = vadd.f32 %v209_v43, %v66_v58 }
  0xc0   :  { %v239_v1 = vadd.f32 %v238_v44, %v66_v58 }
  0xc1   :  { %v250_v6 = vmax.f32 %v210_v0, 0.0 }
  0xc2   :  { %v251_v7 = vmax.f32 %v239_v1, 0.0 }
  0xc6   :  { %v212_v45 = vpop.f32.mrf.mxu0 }
  0xc7   :  { %v241_v46 = vpop.f32.mrf.mxu1  ;;  %v213_v59 = vadd.f32 %v212_v45, %v71_v48 }
  0xc8   :  { %v242_v60 = vadd.f32 %v241_v46, %v71_v48 }
  0xc9   :  { %v252_v4 = vmax.f32 %v213_v59, 0.0 }
  0xca   :  { %v253_v5 = vmax.f32 %v242_v60, 0.0 }
  0xce   :  { %v215_v49 = vpop.f32.mrf.mxu0 }
  0xcf   :  { %v244_v50 = vpop.f32.mrf.mxu1  ;;  %v216_v54 = vadd.f32 %v215_v49, %v76_v51 }
  0xd0   :  { %v245_v55 = vadd.f32 %v244_v50, %v76_v51 }
  0xd1   :  { %v254_v2 = vmax.f32 %v216_v54, 0.0 }
  0xd2   :  { %v255_v3 = vmax.f32 %v245_v55, 0.0 }
  0xd6   :  { %v218_v52 = vpop.f32.mrf.mxu0 }
  0xd7   :  { %v247_v53 = vpop.f32.mrf.mxu1  ;;  %v219_v56 = vadd.f32 %v218_v52, %v81_v47 }
  0xd8   :  { %v248_v57 = vadd.f32 %v247_v53, %v81_v47 }
  0xd9   :  { %v256_v61 = vmax.f32 %v219_v56, 0.0 }
  0xda   :  { %v257_v62 = vmax.f32 %v248_v57, 0.0 }
  0xdb   :  { %311 = vmatpush.msra.mxu2 %v256_v61 }
  0xdc   :  { %340 = vmatpush.msra.mxu3 %v257_v62 }
  0xdd   :  { %312 = vmatpush.msra.mxu2 %v254_v2 }
  0xde   :  { %341 = vmatpush.msra.mxu3 %v255_v3 }
  0xdf   :  { %313 = vmatpush.msra.mxu2 %v252_v4 }
  0xe0   :  { %342 = vmatpush.msra.mxu3 %v253_v5 }
  0xe1   :  { %314 = vmatpush.msra.mxu2 %v250_v6 }
  0xe2   :  { %343 = vmatpush.msra.mxu3 %v251_v7  ;;  %723 = vmatmul.msk.f32.vlgmr.msra.gmra.mxu2 %vm286_vm1, %v258_v8 }
  0xe3   :  { %727 = vmatmul.msk.f32.vlgmr.msra.gmra.mxu3 %vm286_vm1, %v258_v8  ;;  %764 = vmatpush.msrb.mxu2 %v368_v14 }
  0xe4   :  { %765 = vmatpush.msrb.mxu3 %v368_v14 }
  0xe5   :  { %767 = vmatpush.msrb.mxu2 %v367_v15 }
  0xe6   :  { %768 = vmatpush.msrb.mxu3 %v367_v15 }
  0xe7   :  { %770 = vmatpush.msrb.mxu2 %v366_v16 }
  0xe8   :  { %771 = vmatpush.msrb.mxu3 %v366_v16 }
  0xe9   :  { %773 = vmatpush.msrb.mxu2 %v365_v21 }
  0xea   :  { %724 = vmatmul.msk.f32.gmra.mxu2 %vm286_vm1, %v259_v10  ;;  %774 = vmatpush.msrb.mxu3 %v365_v21 }
  0xeb   :  { %728 = vmatmul.msk.f32.gmra.mxu3 %vm286_vm1, %v259_v10 }
  0xf2   :  { %725 = vmatmul.msk.f32.gmra.mxu2 %vm286_vm1, %v260_v11 }
  0xf3   :  { %729 = vmatmul.msk.f32.gmra.mxu3 %vm286_vm1, %v260_v11  ;;  %v1056_v11 = vld [vmem:[%s1232_s5] ss:$0 sm:$0xff] }
  0xfa   :  { %726 = vmatmul.msk.f32.gmra.mxu2 %vm286_vm1, %v261_v12 }
  0xfb   :  { %730 = vmatmul.msk.f32.gmra.mxu3 %vm286_vm1, %v261_v12 }
 0x165   :  { %v316_v17 = vpop.f32.mrf.mxu2 }
 0x166   :  { %v345_v18 = vpop.f32.mrf.mxu3  ;;  %v317_v19 = vadd.f32 %v316_v17, %v269_v13 }
 0x167   :  { %v346_v20 = vadd.f32 %v345_v18, %v269_v13 }
 0x168   :  { %v357_v22 = vmax.f32 %v317_v19, 0.0 }
 0x169   :  { %v358_v23 = vmax.f32 %v346_v20, 0.0 }
 0x16a   :  { %373 = vxpose.xlu2.b32.start [1/4] (short) %v357_v22, 128 }
 0x16b   :  { %405 = vxpose.xlu0.b32.start [1/4] (short) %v358_v23, 128 }
 0x16d   :  { %v319_v25 = vpop.f32.mrf.mxu2 }
 0x16e   :  { %v348_v26 = vpop.f32.mrf.mxu3  ;;  %v320_v27 = vadd.f32 %v319_v25, %v274_v24 }
 0x16f   :  { %v349_v28 = vadd.f32 %v348_v26, %v274_v24 }
 0x170   :  { %v359_v29 = vmax.f32 %v320_v27, 0.0 }
 0x171   :  { %v360_v30 = vmax.f32 %v349_v28, 0.0 }
 0x172   :  { %374 = vxpose.xlu2.b32.cont [2/4] (short) %v359_v29, 128 }
 0x173   :  { %406 = vxpose.xlu0.b32.cont [2/4] (short) %v360_v30, 128 }
 0x175   :  { %v322_v32 = vpop.f32.mrf.mxu2 }
 0x176   :  { %v351_v33 = vpop.f32.mrf.mxu3  ;;  %v323_v34 = vadd.f32 %v322_v32, %v279_v31 }
 0x177   :  { %v352_v35 = vadd.f32 %v351_v33, %v279_v31 }
 0x178   :  { %v361_v36 = vmax.f32 %v323_v34, 0.0 }
 0x179   :  { %v362_v37 = vmax.f32 %v352_v35, 0.0 }
 0x17a   :  { %375 = vxpose.xlu2.b32.cont [3/4] (short) %v361_v36, 128 }
 0x17b   :  { %407 = vxpose.xlu0.b32.cont [3/4] (short) %v362_v37, 128 }
 0x17d   :  { %v325_v39 = vpop.f32.mrf.mxu2 }
 0x17e   :  { %v354_v40 = vpop.f32.mrf.mxu3  ;;  %v326_v41 = vadd.f32 %v325_v39, %v284_v38 }
 0x17f   :  { %v355_v42 = vadd.f32 %v354_v40, %v284_v38 }
 0x180   :  { %v363_v43 = vmax.f32 %v326_v41, 0.0 }
 0x181   :  { %v364_v44 = vmax.f32 %v355_v42, 0.0 }
 0x182   :  { %376 = vxpose.xlu2.b32.end [4/4] (short) %v363_v43, 128 }
 0x183   :  { %408 = vxpose.xlu0.b32.end [4/4] (short) %v364_v44, 128 }
 0x203   :  { %v389_v45 = vpop.trf.xlu2 }
 0x204   :  { %731 = vmatmul.msk.f32.vlgmr.msrb.gmra.mxu0 %vm286_vm1, %v389_v45 }
 0x20b   :  { %v390_v46 = vpop.trf.xlu2 }
 0x20c   :  { %732 = vmatmul.msk.f32.gmra.mxu0 %vm286_vm1, %v390_v46 }
 0x20f   :  { %v421_v47 = vpop.trf.xlu0 }
 0x213   :  { %v391_v48 = vpop.trf.xlu2 }
 0x214   :  { %733 = vmatmul.msk.f32.gmra.mxu0 %vm286_vm1, %v391_v48 }
 0x217   :  { %v1024_v49 = vpop.trf.xlu0 }
 0x21b   :  { %v392_v50 = vpop.trf.xlu2 }
 0x21c   :  { %734 = vmatmul.msk.f32.gmra.mxu0 %vm286_vm1, %v392_v50 }
 0x21f   :  { %v1027_v51 = vpop.trf.xlu0 }
 0x223   :  { %v393_v52 = vpop.trf.xlu2 }
 0x224   :  { %735 = vmatmul.msk.f32.gmra.mxu0 %vm286_vm1, %v393_v52 }
 0x227   :  { %v1030_v53 = vpop.trf.xlu0 }
 0x22b   :  { %v394_v54 = vpop.trf.xlu2 }
 0x22c   :  { %736 = vmatmul.msk.f32.vlgmr.msrb.gmra.mxu1 %vm286_vm1, %v394_v54 }
 0x22f   :  { %v425_v55 = vpop.trf.xlu0 }
 0x230   :  { %751 = vmatmul.msk.f32.vlgmr.msrb.gmra.mxu3 %vm286_vm1, %v425_v55 }
 0x233   :  { %v395_v56 = vpop.trf.xlu2 }
 0x234   :  { %737 = vmatmul.msk.f32.gmra.mxu1 %vm286_vm1, %v395_v56 }
 0x237   :  { %v426_v57 = vpop.trf.xlu0 }
 0x238   :  { %752 = vmatmul.msk.f32.gmra.mxu3 %vm286_vm1, %v426_v57 }
 0x23b   :  { %v396_v58 = vpop.trf.xlu2 }
 0x23c   :  { %738 = vmatmul.msk.f32.gmra.mxu1 %vm286_vm1, %v396_v58 }
 0x23f   :  { %v427_v59 = vpop.trf.xlu0 }
 0x240   :  { %753 = vmatmul.msk.f32.gmra.mxu3 %vm286_vm1, %v427_v59 }
 0x243   :  { %v397_v60 = vpop.trf.xlu2 }
 0x244   :  { %739 = vmatmul.msk.f32.vlgmr.msrb.gmra.mxu2 %vm286_vm1, %v397_v60 }
 0x247   :  { %v428_v61 = vpop.trf.xlu0 }
 0x248   :  { %754 = vmatmul.msk.f32.gmra.mxu3 %vm286_vm1, %v428_v61 }
 0x24b   :  { %v398_v62 = vpop.trf.xlu2 }
 0x24c   :  { %740 = vmatmul.msk.f32.gmra.mxu2 %vm286_vm1, %v398_v62 }
 0x24f   :  { %v429_v63 = vpop.trf.xlu0 }
 0x250   :  { %755 = vmatmul.msk.f32.gmra.mxu3 %vm286_vm1, %v429_v63 }
 0x253   :  { %v399_v0 = vpop.trf.xlu2 }
 0x254   :  { %741 = vmatmul.msk.f32.gmra.mxu2 %vm286_vm1, %v399_v0 }
 0x257   :  { %v430_v1 = vpop.trf.xlu0 }
 0x258   :  { %756 = vmatmul.msk.f32.gmra.mxu3 %vm286_vm1, %v430_v1 }
 0x25b   :  { %v400_v2 = vpop.trf.xlu2 }
 0x25c   :  { %742 = vmatmul.msk.f32.gmra.mxu2 %vm286_vm1, %v400_v2 }
 0x25f   :  { %v431_v3 = vpop.trf.xlu0 }
 0x260   :  { %757 = vmatmul.msk.f32.gmra.mxu3 %vm286_vm1, %v431_v3 }
 0x263   :  { %v401_v4 = vpop.trf.xlu2 }
 0x264   :  { %743 = vmatmul.msk.f32.gmra.mxu2 %vm286_vm1, %v401_v4 }
 0x267   :  { %v432_v5 = vpop.trf.xlu0 }
 0x268   :  { %758 = vmatmul.msk.f32.gmra.mxu3 %vm286_vm1, %v432_v5 }
 0x26b   :  { %v402_v6 = vpop.trf.xlu2 }
 0x26c   :  { %744 = vmatmul.msk.f32.gmra.mxu2 %vm286_vm1, %v402_v6 }
 0x26f   :  { %v433_v7 = vpop.trf.xlu0 }
 0x270   :  { %759 = vmatmul.msk.f32.gmra.mxu3 %vm286_vm1, %v433_v7 }
 0x273   :  { %v403_v8 = vpop.trf.xlu2 }
 0x274   :  { %745 = vmatmul.msk.f32.gmra.mxu2 %vm286_vm1, %v403_v8 }
 0x277   :  { %v434_v9 = vpop.trf.xlu0 }
 0x278   :  { %760 = vmatmul.msk.f32.gmra.mxu3 %vm286_vm1, %v434_v9 }
 0x27b   :  { %v404_v10 = vpop.trf.xlu2 }
 0x27c   :  { %746 = vmatmul.msk.f32.gmra.mxu2 %vm286_vm1, %v404_v10 }
 0x27f   :  { %v435_v12 = vpop.trf.xlu0 }
 0x280   :  { %761 = vmatmul.msk.f32.gmra.mxu3 %vm286_vm1, %v435_v12 }
 0x281   :  { %v550_v13 = vpop.f32.mrf.mxu0 }
 0x282   :  { %v551_v14 = vadd.f32 %v1056_v11, %v550_v13 }
 0x284   :  { %647 = vst.msk [vmem:[%s1233_s6] sm:$0xff] %vm646_vm2, %v551_v14  ;;  %747 = vmatmul.msk.f32.gmra.mxu2 %vm286_vm1, %v421_v47 }
 0x287   :  { %v436_v15 = vpop.trf.xlu0 }
 0x288   :  { %762 = vmatmul.msk.f32.gmra.mxu3 %vm286_vm1, %v436_v15 }
 0x289   :  { %v553_v16 = vpop.f32.mrf.mxu0 }
 0x28a   :  { %v554_v17 = vadd.f32 %v1056_v11, %v553_v16 }
 0x28c   :  { %648 = vst.msk [vmem:[%s1233_s6 + $0x8] sm:$0xff] %vm646_vm2, %v554_v17  ;;  %748 = vmatmul.msk.f32.gmra.mxu2 %vm286_vm1, %v1024_v49 }
 0x291   :  { %v556_v18 = vpop.f32.mrf.mxu0 }
 0x292   :  { %v557_v19 = vadd.f32 %v1056_v11, %v556_v18 }
 0x294   :  { %649 = vst.msk [vmem:[%s1233_s6 + $0x10] sm:$0xff] %vm646_vm2, %v557_v19  ;;  %749 = vmatmul.msk.f32.gmra.mxu2 %vm286_vm1, %v1027_v51 }
 0x299   :  { %v559_v20 = vpop.f32.mrf.mxu0 }
 0x29a   :  { %v560_v21 = vadd.f32 %v1056_v11, %v559_v20 }
 0x29c   :  { %650 = vst.msk [vmem:[%s1233_s6 + $0x18] sm:$0xff] %vm646_vm2, %v560_v21  ;;  %750 = vmatmul.msk.f32.gmra.mxu2 %vm286_vm1, %v1030_v53 }
 0x2a1   :  { %v562_v22 = vpop.f32.mrf.mxu0 }
 0x2a2   :  { %v563_v23 = vadd.f32 %v1056_v11, %v562_v22 }
 0x2a4   :  { %651 = vst.msk [vmem:[%s1233_s6 + $0x20] sm:$0xff] %vm646_vm2, %v563_v23 }
 0x2a9   :  { %v565_v24 = vpop.f32.mrf.mxu1 }
 0x2aa   :  { %v566_v25 = vadd.f32 %v1056_v11, %v565_v24 }
 0x2ac   :  { %652 = vst.msk [vmem:[%s1233_s6 + $0x28] sm:$0xff] %vm646_vm2, %v566_v25 }
 0x2b1   :  { %v568_v26 = vpop.f32.mrf.mxu1 }
 0x2b2   :  { %v569_v27 = vadd.f32 %v1056_v11, %v568_v26 }
 0x2b3   :  { %v610_v28 = vpop.f32.mrf.mxu3 }
 0x2b4   :  { %v611_v29 = vadd.f32 %v1056_v11, %v610_v28  ;;  %653 = vst.msk [vmem:[%s1233_s6 + $0x30] sm:$0xff] %vm646_vm2, %v569_v27 }
 0x2b6   :  { %667 = vst.msk [vmem:[%s1233_s6 + $0xa0] sm:$0xff] %vm646_vm2, %v611_v29 }
 0x2b9   :  { %v571_v30 = vpop.f32.mrf.mxu1 }
 0x2ba   :  { %v572_v31 = vadd.f32 %v1056_v11, %v571_v30 }
 0x2bb   :  { %v613_v32 = vpop.f32.mrf.mxu3 }
 0x2bc   :  { %v614_v33 = vadd.f32 %v1056_v11, %v613_v32  ;;  %654 = vst.msk [vmem:[%s1233_s6 + $0x38] sm:$0xff] %vm646_vm2, %v572_v31 }
 0x2be   :  { %668 = vst.msk [vmem:[%s1233_s6 + $0xa8] sm:$0xff] %vm646_vm2, %v614_v33 }
 0x2c3   :  { %v616_v34 = vpop.f32.mrf.mxu3 }
 0x2c4   :  { %v617_v35 = vadd.f32 %v1056_v11, %v616_v34 }
 0x2c6   :  { %669 = vst.msk [vmem:[%s1233_s6 + $0xb0] sm:$0xff] %vm646_vm2, %v617_v35 }
 0x2c7   :  { %v574_v36 = vpop.f32.mrf.mxu2 }
 0x2c8   :  { %v575_v37 = vadd.f32 %v1056_v11, %v574_v36 }
 0x2ca   :  { %655 = vst.msk [vmem:[%s1233_s6 + $0x40] sm:$0xff] %vm646_vm2, %v575_v37 }
 0x2cb   :  { %v619_v38 = vpop.f32.mrf.mxu3 }
 0x2cc   :  { %v620_v39 = vadd.f32 %v1056_v11, %v619_v38 }
 0x2ce   :  { %670 = vst.msk [vmem:[%s1233_s6 + $0xb8] sm:$0xff] %vm646_vm2, %v620_v39 }
 0x2cf   :  { %v577_v40 = vpop.f32.mrf.mxu2 }
 0x2d0   :  { %v578_v41 = vadd.f32 %v1056_v11, %v577_v40 }
 0x2d2   :  { %656 = vst.msk [vmem:[%s1233_s6 + $0x48] sm:$0xff] %vm646_vm2, %v578_v41 }
 0x2d3   :  { %v622_v42 = vpop.f32.mrf.mxu3 }
 0x2d4   :  { %v623_v43 = vadd.f32 %v1056_v11, %v622_v42 }
 0x2d6   :  { %671 = vst.msk [vmem:[%s1233_s6 + $0xc0] sm:$0xff] %vm646_vm2, %v623_v43 }
 0x2d7   :  { %v580_v44 = vpop.f32.mrf.mxu2 }
 0x2d8   :  { %v581_v45 = vadd.f32 %v1056_v11, %v580_v44 }
 0x2da   :  { %657 = vst.msk [vmem:[%s1233_s6 + $0x50] sm:$0xff] %vm646_vm2, %v581_v45 }
 0x2db   :  { %v625_v46 = vpop.f32.mrf.mxu3 }
 0x2dc   :  { %v626_v47 = vadd.f32 %v1056_v11, %v625_v46 }
 0x2de   :  { %672 = vst.msk [vmem:[%s1233_s6 + $0xc8] sm:$0xff] %vm646_vm2, %v626_v47 }
 0x2df   :  { %v583_v48 = vpop.f32.mrf.mxu2 }
 0x2e0   :  { %v584_v49 = vadd.f32 %v1056_v11, %v583_v48 }
 0x2e2   :  { %658 = vst.msk [vmem:[%s1233_s6 + $0x58] sm:$0xff] %vm646_vm2, %v584_v49 }
 0x2e3   :  { %v628_v50 = vpop.f32.mrf.mxu3 }
 0x2e4   :  { %v629_v51 = vadd.f32 %v1056_v11, %v628_v50 }
 0x2e6   :  { %673 = vst.msk [vmem:[%s1233_s6 + $0xd0] sm:$0xff] %vm646_vm2, %v629_v51 }
 0x2e7   :  { %v586_v52 = vpop.f32.mrf.mxu2 }
 0x2e8   :  { %v587_v53 = vadd.f32 %v1056_v11, %v586_v52 }
 0x2ea   :  { %659 = vst.msk [vmem:[%s1233_s6 + $0x60] sm:$0xff] %vm646_vm2, %v587_v53 }
 0x2eb   :  { %v631_v54 = vpop.f32.mrf.mxu3 }
 0x2ec   :  { %v632_v55 = vadd.f32 %v1056_v11, %v631_v54 }
 0x2ee   :  { %674 = vst.msk [vmem:[%s1233_s6 + $0xd8] sm:$0xff] %vm646_vm2, %v632_v55 }
 0x2ef   :  { %v589_v56 = vpop.f32.mrf.mxu2 }
 0x2f0   :  { %v590_v57 = vadd.f32 %v1056_v11, %v589_v56 }
 0x2f2   :  { %660 = vst.msk [vmem:[%s1233_s6 + $0x68] sm:$0xff] %vm646_vm2, %v590_v57 }
 0x2f3   :  { %v634_v58 = vpop.f32.mrf.mxu3 }
 0x2f4   :  { %v635_v59 = vadd.f32 %v1056_v11, %v634_v58 }
 0x2f6   :  { %675 = vst.msk [vmem:[%s1233_s6 + $0xe0] sm:$0xff] %vm646_vm2, %v635_v59 }
 0x2f7   :  { %v592_v60 = vpop.f32.mrf.mxu2 }
 0x2f8   :  { %v593_v61 = vadd.f32 %v1056_v11, %v592_v60 }
 0x2fa   :  { %661 = vst.msk [vmem:[%s1233_s6 + $0x70] sm:$0xff] %vm646_vm2, %v593_v61 }
 0x2fb   :  { %v637_v62 = vpop.f32.mrf.mxu3 }
 0x2fc   :  { %v638_v63 = vadd.f32 %v1056_v11, %v637_v62 }
 0x2fe   :  { %676 = vst.msk [vmem:[%s1233_s6 + $0xe8] sm:$0xff] %vm646_vm2, %v638_v63 }
 0x2ff   :  { %v595_v0 = vpop.f32.mrf.mxu2 }
 0x300   :  { %v596_v1 = vadd.f32 %v1056_v11, %v595_v0 }
 0x302   :  { %662 = vst.msk [vmem:[%s1233_s6 + $0x78] sm:$0xff] %vm646_vm2, %v596_v1 }
 0x303   :  { %v640_v2 = vpop.f32.mrf.mxu3 }
 0x304   :  { %v641_v3 = vadd.f32 %v1056_v11, %v640_v2 }
 0x306   :  { %677 = vst.msk [vmem:[%s1233_s6 + $0xf0] sm:$0xff] %vm646_vm2, %v641_v3 }
 0x307   :  { %v598_v4 = vpop.f32.mrf.mxu2 }
 0x308   :  { %v599_v5 = vadd.f32 %v1056_v11, %v598_v4 }
 0x30a   :  { %663 = vst.msk [vmem:[%s1233_s6 + $0x80] sm:$0xff] %vm646_vm2, %v599_v5 }
 0x30b   :  { %v643_v6 = vpop.f32.mrf.mxu3 }
 0x30c   :  { %v644_v7 = vadd.f32 %v1056_v11, %v643_v6 }
 0x30e   :  { %678 = vst.msk [vmem:[%s1233_s6 + $0xf8] sm:$0xff] %vm646_vm2, %v644_v7 }
 0x30f   :  { %v601_v8 = vpop.f32.mrf.mxu2 }
 0x310   :  { %v602_v9 = vadd.f32 %v1056_v11, %v601_v8 }
 0x312   :  { %664 = vst.msk [vmem:[%s1233_s6 + $0x88] sm:$0xff] %vm646_vm2, %v602_v9 }
 0x317   :  { %v604_v10 = vpop.f32.mrf.mxu2 }
 0x318   :  { %v605_v12 = vadd.f32 %v1056_v11, %v604_v10 }
 0x31a   :  { %665 = vst.msk [vmem:[%s1233_s6 + $0x90] sm:$0xff] %vm646_vm2, %v605_v12 }
 0x31f   :  { %v607_v13 = vpop.f32.mrf.mxu2 }
 0x320   :  { %v608_v14 = vadd.f32 %v1056_v11, %v607_v13 }
 0x322   :  { %666 = vst.msk [vmem:[%s1233_s6 + $0x98] sm:$0xff] %vm646_vm2, %v608_v14 }

</bundles_post_ra>
